<compile_context>
chip_gen: v5e
topology: v5e:2x2
jax: 0.10.0
libtpu: 0.0.40
codegen_flags: <defaults>
</compile_context>

<pallas_src>
import jax
import jax.numpy as jnp
from jax.experimental import pallas as pl
from jax.experimental.pallas import tpu as pltpu


# ----------------------------- kernel body ---------------------------------

def _posenc_add_kernel(x_ref, pe_ref, o_ref):
    # x_ref : (tb, tn) tile of the flattened (B, S*E) token plane.
    # pe_ref: (1,  tn) tile of the flattened positional table (broadcast over
    #         the batch/sublane axis).  Pure VPU elementwise add, lane-dense
    #         store, explicit cast to the output dtype.
    o_ref[...] = (x_ref[...] + pe_ref[...]).astype(o_ref.dtype)


# --------------------------- table construction -----------------------------

def make_sinusoidal_table(seq_len: int, embed_dim: int) -> jnp.ndarray:
    """Replicates the PyTorch buffer:
       pe[p, 2k]   = sin(p / 10000^(2k / E))
       pe[p, 2k+1] = cos(p / 10000^(2k / E))
    """
    pos = jnp.arange(seq_len, dtype=jnp.float32)[:, None]            # (S, 1)
    dim = jnp.arange(embed_dim, dtype=jnp.float32)[None, :]          # (1, E)
    denom = jnp.power(10000.0, 2.0 * jnp.floor(dim / 2.0) / float(embed_dim))
    angles = pos / denom                                              # (S, E)
    even = (jnp.arange(embed_dim) % 2 == 0)[None, :]
    return jnp.where(even, jnp.sin(angles), jnp.cos(angles)).astype(jnp.float32)


# ------------------------------ tile helpers --------------------------------

def _sublane_unit(dtype) -> int:
    # packed-dtype sublane tiling: f32 -> 8, bf16/f16 -> 16, int8/fp8 -> 32
    return {4: 8, 2: 16, 1: 32}.get(jnp.dtype(dtype).itemsize, 8)


def _is_v7x() -> bool:
    try:
        kind = jax.devices()[0].device_kind.lower()
        return ("v7" in kind) or ("tpu7" in kind)
    except Exception:
        return False


def _choose_tiles(B: int, N: int, dtype, *, lane_cap: int, block_bytes_cap: int):
    """Fixed, (sublane, 128)-aligned tiles used with a cdiv grid.  Returns
    (tb, tn) with tb*tn*itemsize <= block_bytes_cap (when B, N are big enough)."""
    item = jnp.dtype(dtype).itemsize
    sub = _sublane_unit(dtype)

    # Lane tile: multiple of 128 (or the full extent when N <= 128).
    if N <= 128:
        tn = N
    else:
        tn = min(lane_cap, (N // 128) * 128)

    # Sublane tile: full extent when B is small, otherwise a multiple of the
    # packed sublane unit bounded by the per-block byte budget.
    if B <= sub:
        tb = B
    else:
        budget = max(sub, (block_bytes_cap // max(tn * item, 1)) // sub * sub)
        tb = min(budget, (B // sub) * sub)
    return tb, tn


# ------------------------------ public wrapper ------------------------------

def positional_encoding(x, pos_table, *,
                        max_lane_tile: int = 32768,
                        block_bytes_cap: int = 4 << 20,
                        donate_x: bool = False):
    """x: (B, S, E).  pos_table: (seq_len, E) with seq_len >= S (f32 buffer).
    Returns x + pos_table[None, :S, :] in x.dtype."""
    B, S, E = x.shape
    assert pos_table.shape[0] >= S and pos_table.shape[1] == E, "table too small"

    # Slice like the PyTorch forward and match the compute dtype of x so bf16
    # inputs do not pay f32 pe traffic / up-down casts.
    pe = pos_table[:S, :].astype(x.dtype)

    N = S * E
    x2d = x.reshape(B, N)            # lane-dense token plane (row-major view)
    pe2d = pe.reshape(1, N)          # broadcast over the batch sublanes

    itemsize = jnp.dtype(x.dtype).itemsize
    tb, tn = _choose_tiles(B, N, x.dtype,
                           lane_cap=max_lane_tile,
                           block_bytes_cap=block_bytes_cap)

    # Grid: lane-blocks OUTER, batch-blocks INNER so pe's block index (0, j)
    # is constant across consecutive steps -> Pallas skips its re-fetch.
    grid = (pl.cdiv(N, tn), pl.cdiv(B, tb))

    # v7x only: avoid collapsing to a single grid step (2 TensorCores shard
    # "parallel" axes).  On v5e/v6e this would only add per-step overhead.
    if _is_v7x() and grid[0] * grid[1] == 1 and tn % 256 == 0:
        tn //= 2
        grid = (pl.cdiv(N, tn), pl.cdiv(B, tb))

    # Scoped VMEM: 2 buffers x (x block + out block) + pe (padded to 8
    # sublanes) x 2 + headroom; clamp under v7x's 64 MiB physical VMEM.
    block_bytes = tb * tn * itemsize
    pe_bytes = 8 * tn * itemsize
    vmem_needed = 4 * block_bytes + 2 * pe_bytes + (2 << 20)
    vmem_limit = int(min(max(vmem_needed, 32 << 20), 48 << 20))

    # TODO(synk): when B < sublane-unit AND the shape is step-overhead bound,
    # fold part of S into the sublane axis ((B*S1, S2*E) layout) to fill vregs.
    out2d = pl.pallas_call(
        _posenc_add_kernel,
        out_shape=jax.ShapeDtypeStruct((B, N), x.dtype),
        grid_spec=pltpu.PrefetchScalarGridSpec(
            num_scalar_prefetch=0,
            grid=grid,
            in_specs=[
                pl.BlockSpec((tb, tn), lambda j, i: (i, j)),   # x tile
                pl.BlockSpec((1, tn), lambda j, i: (0, j)),    # pe tile (resident across i)
            ],
            out_specs=pl.BlockSpec((tb, tn), lambda j, i: (i, j)),
        ),
        compiler_params=pltpu.CompilerParams(
            dimension_semantics=("parallel", "parallel"),
            vmem_limit_bytes=vmem_limit,
        ),
        input_output_aliases=({0: 0} if donate_x else {}),
    )(x2d, pe2d)

    return out2d.reshape(B, S, E)


# ----------------------------------- demo -----------------------------------

if __name__ == "__main__":
    # Small shapes consistent with the module: table built for seq_len=16,
    # applied to an input with seq=8 (exercising the [:, :x.size(1), :] slice).
    batch, seq, embed_dim = 2, 8, 32
    table_seq_len = 16

    key = jax.random.PRNGKey(0)
    x = jax.random.normal(key, (batch, seq, embed_dim), jnp.float32)

    # Built once at "init", like the PyTorch register_buffer.
    pos_table = make_sinusoidal_table(table_seq_len, embed_dim)

    out = positional_encoding(x, pos_table)
    jax.block_until_ready(out)

    # Pure-JAX reference: forward(x) = x + pos_encoding[:, :S, :]
    ref = x + pos_table[None, :seq, :]
    assert out.shape == ref.shape
    assert jnp.allclose(out, ref, atol=1e-6, rtol=0.0), "mismatch vs reference"

    print("KERNEL_OK")
</pallas_src>

<mosaic_0001>
module attributes {stable_mosaic.version = 11 : i64} {
  func.func @_posenc_add_kernel(%arg0: i32, %arg1: i32, %arg2: memref<2x256xf32, #tpu.memory_space<vmem>>, %arg3: memref<1x256xf32, #tpu.memory_space<vmem>>, %arg4: memref<2x256xf32, #tpu.memory_space<vmem>>) attributes {dimension_semantics = [#tpu.dimension_semantics<parallel>, #tpu.dimension_semantics<parallel>], iteration_bounds = array<i64: 1, 1>, scalar_prefetch = 0 : i64, scratch_operands = 0 : i64, tpu.core_type = #tpu.core_type<tc>, window_params = [{transform_indices = @transform_0, window_bounds = array<i64: 2, 256>}, {transform_indices = @transform_1, window_bounds = array<i64: 1, 256>}, {transform_indices = @transform_2, window_bounds = array<i64: 2, 256>}]} {
    %c0 = arith.constant 0 : index
    %c0_0 = arith.constant 0 : index
    %0 = vector.load %arg2[%c0, %c0_0] : memref<2x256xf32, #tpu.memory_space<vmem>>, vector<2x256xf32>
    %c0_1 = arith.constant 0 : index
    %c0_2 = arith.constant 0 : index
    %1 = vector.load %arg3[%c0_1, %c0_2] : memref<1x256xf32, #tpu.memory_space<vmem>>, vector<1x256xf32>
    %2 = vector.broadcast %1 : vector<1x256xf32> to vector<2x256xf32>
    %3 = arith.addf %0, %2 : vector<2x256xf32>
    %c0_3 = arith.constant 0 : index
    %c0_4 = arith.constant 0 : index
    %4 = vector.load %arg4[%c0_3, %c0_4] : memref<2x256xf32, #tpu.memory_space<vmem>>, vector<2x256xf32>
    tpu.vector_store %arg4[%c0_3, %c0_4], %3 {strides = array<i32>} : memref<2x256xf32, #tpu.memory_space<vmem>>, vector<2x256xf32>,
    return
  }
  func.func @transform_0(%arg0: i32, %arg1: i32) -> (i32, i32) {
    %c0_i32 = arith.constant 0 : i32
    return %arg1, %arg0 : i32, i32
  }
  func.func @transform_1(%arg0: i32, %arg1: i32) -> (i32, i32) {
    %c0_i32 = arith.constant 0 : i32
    %c0_i32_0 = arith.constant 0 : i32
    return %c0_i32, %arg0 : i32, i32
  }
  func.func @transform_2(%arg0: i32, %arg1: i32) -> (i32, i32) {
    %c0_i32 = arith.constant 0 : i32
    return %arg1, %arg0 : i32, i32
  }
}

</mosaic_0001>

<bundles_post_ra>
// kernel: tpu_custom_call.1
= control target key start
LH: loop header
LB: loop body
LE: loop exit
PB: predicated region body
PF: predicated region fallthrough
CT: control target
= control target key end

     0   :  { %7 = vsyncpa [#allocation3], 0  ;;  %s177_s0 = inlined_call_operand.hbm [shape: f32[2,256], index: 0, kind: input, shape index: {}]   ;;  %s178_s1 = inlined_call_operand.hbm [shape: f32[1,256], index: 1, kind: input, shape index: {}]   ;;  %s179_s2 = inlined_call_operand.hbm [shape: f32[2,256], index: 2, kind: output, shape index: {}]  }
   0x1   :  { %8 = vsyncpa [#allocation6], 0 }
   0x2   :  { %9 = vsyncpa [#allocation4], 0  ;;  %s15_s11 = sshll.u32 %s177_s0, 4  ;;  %s150_s12 = smov [#allocation2]   ;;  %s16_s11 = int_to_ptr.hbm [resolvable:$true] %s15_s11 }
   0x3   :  { %s17_s13 = sshll.u32 %s150_s12, 4  ;;  %s26_s16 = sshll.u32 %s178_s1, 4  ;;  %s18_s13 = int_to_ptr.vmem [resolvable:$true] %s17_s13  ;;  %s27_s16 = int_to_ptr.hbm [resolvable:$true] %s26_s16 }
   0x4   :  { %20 = dma.hbm_to_vmem [thread:$0]  %s16_s11, 64, %s18_s13, [#allocation3]  }
   0x5   :  { %s151_s17 = smov [#allocation5]  }
   0x6   :  { %s28_s18 = sshll.u32 %s151_s17, 4  ;;  %s29_s18 = int_to_ptr.vmem [resolvable:$true] %s28_s18 }
   0x7   :  { %31 = dma.hbm_to_vmem [thread:$0]  %s27_s16, 32, %s29_s18, [#allocation6]  }
   0x8   :  { %144 = dma.done.wait [#allocation3], 64  }
   0x9   :  { %145 = vsyncadd [#allocation3], 4294967232 }
   0xa   :  { %146 = dma.done.wait [#allocation6], 32  }
   0xb   :  { %147 = vsyncadd [#allocation6], 4294967264  ;;  %v41_v0 = vld [vmem:[#allocation5] sm:$0x3]  ;;  %vm46_vm0 = vcmask 1041408   ;;  %s152_s0 = smov [#allocation7]  }
   0xc   :  { %v43_v1 = vperm.slane %v41_v0, 0  ;;  %v44_v2 = vperm.slane %v41_v0, 1  ;;  %v40_v3 = vld [vmem:[#allocation2] sm:$0xf]  ;;  %s56_s19 = sshll.u32 %s152_s0, 4  ;;  %s58_s21 = sshll.u32 %s179_s2, 4  ;;  %s57_s19 = int_to_ptr.vmem [resolvable:$true] %s56_s19  ;;  %s59_s21 = int_to_ptr.hbm [resolvable:$true] %s58_s21 }
   0xe   :  { %v45_v4 = vrot.slane %v44_v2, 6 }
  0x10   :  { %v47_v5 = vsel %vm46_vm0, %v43_v1, %v45_v4 }
  0x11   :  { %v49_v6 = vadd.f32 %v47_v5, %v40_v3 }
  0x13   :  { %50 = vst [vmem:[#allocation7] sm:$0xf] %v49_v6 }
  0x14   :  { %61 = dma.vmem_to_hbm [thread:$0]  %s57_s19, 64, %s59_s21, [#allocation4]  }
  0x15   :  { %148 = dma.done.wait [#allocation4], 64  }
  0x16   :  { %149 = vsyncadd [#allocation4], 4294967232 }
  0x17   :  { %66 = vsyncpa [#allocation3], 1 }
  0x18   :  { %67 = vsyncpa [#allocation6], 1 }
  0x19   :  { %68 = vsyncpa [#allocation4], 1 }

</bundles_post_ra>
